<compile_context>
chip_gen: v6e
topology: v6e:2x2x1
jax: 0.10.0
libtpu: 0.0.40
codegen_flags: <defaults>
</compile_context>

<pallas_src>
import functools

import jax
import jax.numpy as jnp
from jax.experimental import pallas as pl
from jax.experimental.pallas import tpu as pltpu


def _round_up(n, m):
    return ((n + m - 1) // m) * m


def ac_kernel(x_ref, w1t_ref, b1_ref, w2t_ref, b2t_ref, o_ref, acc_ref, *, hw_true):
    """One (batch b, spatial-chunk h) grid step.

    x_ref   : (1, C, hw_tile)  input chunk (native dtype, zero padded)
    w1t_ref : (Cr, C)  first Linear weight, transposed
    b1_ref  : (Cr, 1)  first Linear bias (column vector)
    w2t_ref : (C, Cr)  second Linear weight, transposed, BN folded in
    b2t_ref : (C, 1)   second Linear bias, BN folded in
    o_ref   : (1, C, 1) output gate for this batch element
    acc_ref : (C, 1) f32 running spatial sum (resident across the HW axis)
    """
    hw_i = pl.program_id(1)

    @pl.when(hw_i == 0)
    def _():
        acc_ref[...] = jnp.zeros_like(acc_ref)

    # Partial spatial sum for this chunk, accumulated in f32.  (The XLU lane
    # reduce is fully hidden under the HBM stream; an MXU dot-with-ones would
    # also work but is unnecessary here.)
    chunk = x_ref[0].astype(jnp.float32)                        # (C, hw_tile)
    acc_ref[...] += jnp.sum(chunk, axis=-1, keepdims=True)      # (C, 1)

    # Tiny FC tail: only once, on the last spatial chunk; single output store.
    @pl.when(hw_i == pl.num_programs(1) - 1)
    def _():
        pooled = acc_ref[...] * (1.0 / hw_true)                 # (C, 1)
        h = jnp.dot(w1t_ref[...], pooled,
                    preferred_element_type=jnp.float32) + b1_ref[...]    # (Cr, 1)
        y = jnp.dot(w2t_ref[...], h,
                    preferred_element_type=jnp.float32) + b2t_ref[...]   # (C, 1)
        o_ref[...] = y[None].astype(o_ref.dtype)                # (1, C, 1)


def ac_forward(x, params, *, hw_tile=512, eps=1e-5):
    """x: (B, C, H, W) NCHW (f32 or bf16). Returns (B, C, 1, 1) like PyTorch AC."""
    B, C, H, W = x.shape
    HW = H * W

    # --- fold inference BatchNorm1d into the second Linear -------------------
    scale = params["gamma"] * jax.lax.rsqrt(params["rvar"] + eps)        # (1, C)
    w2_f = params["w2"] * scale                                          # (Cr, C)
    b2_f = (params["b2"] - params["rmean"]) * scale + params["beta"]     # (1, C)

    # Kernel-friendly (pre-transposed, column-vector) parameter layouts.
    Cr = params["w1"].shape[1]
    w1t = params["w1"].T.astype(jnp.float32)                    # (Cr, C)
    b1c = params["b1"].reshape(Cr, 1).astype(jnp.float32)       # (Cr, 1)
    w2t = w2_f.T.astype(jnp.float32)                            # (C, Cr)
    b2c = b2_f.reshape(C, 1).astype(jnp.float32)                # (C, 1)

    # --- tile the spatial axis (lane-dense, multiple of 128) -----------------
    hw_tile = min(hw_tile, _round_up(HW, 128))
    hw_pad = _round_up(HW, hw_tile)
    xf = x.reshape(B, C, HW)                                    # keep native dtype
    if hw_pad != HW:
        # Zero padding leaves the spatial sum unchanged; we divide by true HW.
        xf = jnp.pad(xf, ((0, 0), (0, 0), (0, hw_pad - HW)))
    n_hw = hw_pad // hw_tile

    # Explicit VMEM budget: double-buffered input tile + params/output/scratch,
    # capped at 48 MiB so it fits v7x's 64 MiB physical VMEM with headroom.
    block_bytes = C * hw_tile * xf.dtype.itemsize
    vmem_limit = int(min(max(4 * block_bytes + (4 << 20), 32 << 20), 48 << 20))

    kernel = functools.partial(ac_kernel, hw_true=HW)

    def param_spec(shape):
        return pl.BlockSpec(shape, lambda b, h: (0, 0))

    out = pl.pallas_call(
        kernel,
        out_shape=jax.ShapeDtypeStruct((B, C, 1), jnp.float32),
        grid_spec=pltpu.PrefetchScalarGridSpec(
            num_scalar_prefetch=0,
            grid=(B, n_hw),
            in_specs=[
                pl.BlockSpec((1, C, hw_tile), lambda b, h: (b, 0, h)),   # x stream
                param_spec((Cr, C)),                                     # w1^T
                param_spec((Cr, 1)),                                     # b1
                param_spec((C, Cr)),                                     # w2'^T (BN folded)
                param_spec((C, 1)),                                      # b2'   (BN folded)
            ],
            out_specs=pl.BlockSpec((1, C, 1), lambda b, h: (b, 0, 0)),
            scratch_shapes=[pltpu.VMEM((C, 1), jnp.float32)],
        ),
        compiler_params=pltpu.CompilerParams(
            dimension_semantics=("parallel", "arbitrary"),
            vmem_limit_bytes=vmem_limit,
        ),
    )(xf, w1t, b1c, w2t, b2c)

    # .unsqueeze(2).unsqueeze(3).expand_as(avg_pool) -> (B, C, 1, 1)
    return out.reshape(B, C, 1, 1)


def ac_reference(x, params):
    """Pure-JAX reference (inference-mode BN, un-folded) for verification."""
    B, C, H, W = x.shape
    pooled = jnp.mean(x.astype(jnp.float32).reshape(B, C, H * W), axis=-1)
    h = pooled @ params["w1"] + params["b1"]
    y = h @ params["w2"] + params["b2"]
    eps = 1e-5
    bn = (y - params["rmean"]) / jnp.sqrt(params["rvar"] + eps) \
         * params["gamma"] + params["beta"]
    return bn.reshape(B, C, 1, 1)


def init_params(key, gate_channel, reduction_ratio=16):
    C = gate_channel
    Cr = C // reduction_ratio
    ks = jax.random.split(key, 8)
    # PyTorch Linear default init: U(-1/sqrt(fan_in), 1/sqrt(fan_in))
    bound1 = 1.0 / jnp.sqrt(C)
    bound2 = 1.0 / jnp.sqrt(Cr)
    return {
        "w1": jax.random.uniform(ks[0], (C, Cr), jnp.float32, -bound1, bound1),
        "b1": jax.random.uniform(ks[1], (1, Cr), jnp.float32, -bound1, bound1),
        "w2": jax.random.uniform(ks[2], (Cr, C), jnp.float32, -bound2, bound2),
        "b2": jax.random.uniform(ks[3], (1, C), jnp.float32, -bound2, bound2),
        # BatchNorm1d affine + running stats (deterministic, non-trivial)
        "gamma": 1.0 + 0.1 * jax.random.normal(ks[4], (1, C), jnp.float32),
        "beta": 0.1 * jax.random.normal(ks[5], (1, C), jnp.float32),
        "rmean": 0.1 * jax.random.normal(ks[6], (1, C), jnp.float32),
        "rvar": jax.random.uniform(ks[7], (1, C), jnp.float32, 0.5, 1.5),
    }


if __name__ == "__main__":
    key = jax.random.PRNGKey(0)
    k_x, k_p, k_x2 = jax.random.split(key, 3)

    # gate_channel=32 (divisible by reduction_ratio=16 -> hidden=2)
    B, C, H, W = 2, 32, 16, 16
    params = init_params(k_p, C, reduction_ratio=16)

    # Case 1: single HW step (HW=256 fits one lane tile).
    x = jax.random.normal(k_x, (B, C, H, W), jnp.float32)
    out = jax.block_until_ready(ac_forward(x, params))
    ref = ac_reference(x, params)
    assert out.shape == (B, C, 1, 1), out.shape
    assert jnp.allclose(out, ref, atol=1e-5, rtol=1e-5), \
        float(jnp.max(jnp.abs(out - ref)))

    # Case 2: multi-step accumulation + ragged tail padding (HW=576, tile=256).
    x2 = jax.random.normal(k_x2, (B, C, 24, 24), jnp.float32)
    out2 = jax.block_until_ready(ac_forward(x2, params, hw_tile=256))
    ref2 = ac_reference(x2, params)
    assert jnp.allclose(out2, ref2, atol=1e-5, rtol=1e-5), \
        float(jnp.max(jnp.abs(out2 - ref2)))

    print("KERNEL_OK")
</pallas_src>

<mosaic_0001>
module attributes {stable_mosaic.version = 11 : i64} {
  func.func @ac_kernel(%arg0: i32, %arg1: i32, %arg2: memref<1x32x256xf32, #tpu.memory_space<vmem>>, %arg3: memref<2x32xf32, #tpu.memory_space<vmem>>, %arg4: memref<2x1xf32, #tpu.memory_space<vmem>>, %arg5: memref<32x2xf32, #tpu.memory_space<vmem>>, %arg6: memref<32x1xf32, #tpu.memory_space<vmem>>, %arg7: memref<1x32x1xf32, #tpu.memory_space<vmem>>, %arg8: memref<32x1xf32, #tpu.memory_space<vmem>>) attributes {dimension_semantics = [#tpu.dimension_semantics<parallel>, #tpu.dimension_semantics<arbitrary>], iteration_bounds = array<i64: 2, 1>, scalar_prefetch = 0 : i64, scratch_operands = 1 : i64, tpu.core_type = #tpu.core_type<tc>, window_params = [{transform_indices = @transform_0, window_bounds = array<i64: 1, 32, 256>}, {pipeline_mode = #tpu.pipeline_mode<synchronous>, transform_indices = @transform_1, window_bounds = array<i64: 2, 32>}, {pipeline_mode = #tpu.pipeline_mode<synchronous>, transform_indices = @transform_2, window_bounds = array<i64: 2, 1>}, {pipeline_mode = #tpu.pipeline_mode<synchronous>, transform_indices = @transform_3, window_bounds = array<i64: 32, 2>}, {pipeline_mode = #tpu.pipeline_mode<synchronous>, transform_indices = @transform_4, window_bounds = array<i64: 32, 1>}, {transform_indices = @transform_5, window_bounds = array<i64: 1, 32, 1>}]} {
    %c0_i32 = arith.constant 0 : i32
    %0 = arith.cmpi eq, %arg1, %c0_i32 : i32
    %1 = arith.extui %0 : i1 to i32
    %c0_i32_0 = arith.constant 0 : i32
    %2 = arith.cmpi ne, %1, %c0_i32_0 : i32
    scf.if %2 {
      %cst_9 = arith.constant 0.000000e+00 : f32
      %13 = vector.broadcast %cst_9 : f32 to vector<32x1xf32>
      %c0_10 = arith.constant 0 : index
      %c0_11 = arith.constant 0 : index
      %14 = vector.load %arg8[%c0_10, %c0_11] : memref<32x1xf32, #tpu.memory_space<vmem>>, vector<32x1xf32>
      tpu.vector_store %arg8[%c0_10, %c0_11], %13 {strides = array<i32>} : memref<32x1xf32, #tpu.memory_space<vmem>>, vector<32x1xf32>,
    } else {
    }
    %c0 = arith.constant 0 : index
    %c0_1 = arith.constant 0 : index
    %c0_2 = arith.constant 0 : index
    %3 = vector.load %arg2[%c0, %c0_1, %c0_2] : memref<1x32x256xf32, #tpu.memory_space<vmem>>, vector<1x32x256xf32>
    %4 = vector.shape_cast %3 : vector<1x32x256xf32> to vector<32x256xf32>
    %c0_3 = arith.constant 0 : index
    %c0_4 = arith.constant 0 : index
    %5 = vector.load %arg8[%c0_3, %c0_4] : memref<32x1xf32, #tpu.memory_space<vmem>>, vector<32x1xf32>
    %cst = arith.constant dense<0.000000e+00> : vector<32xf32>
    %6 = vector.multi_reduction <add>, %4, %cst [1] : vector<32x256xf32> to vector<32xf32>
    %7 = vector.shape_cast %6 : vector<32xf32> to vector<32x1xf32>
    %8 = arith.addf %5, %7 : vector<32x1xf32>
    %c0_5 = arith.constant 0 : index
    %c0_6 = arith.constant 0 : index
    %9 = vector.load %arg8[%c0_5, %c0_6] : memref<32x1xf32, #tpu.memory_space<vmem>>, vector<32x1xf32>
    tpu.vector_store %arg8[%c0_5, %c0_6], %8 {strides = array<i32>} : memref<32x1xf32, #tpu.memory_space<vmem>>, vector<32x1xf32>,
    %c0_i32_7 = arith.constant 0 : i32
    %10 = arith.cmpi eq, %arg1, %c0_i32_7 : i32
    %11 = arith.extui %10 : i1 to i32
    %c0_i32_8 = arith.constant 0 : i32
    %12 = arith.cmpi ne, %11, %c0_i32_8 : i32
    scf.if %12 {
      %c0_9 = arith.constant 0 : index
      %c0_10 = arith.constant 0 : index
      %13 = vector.load %arg8[%c0_9, %c0_10] : memref<32x1xf32, #tpu.memory_space<vmem>>, vector<32x1xf32>
      %cst_11 = arith.constant 3.906250e-03 : f32
      %14 = vector.broadcast %cst_11 : f32 to vector<32x1xf32>
      %15 = arith.mulf %13, %14 : vector<32x1xf32>
      %c0_12 = arith.constant 0 : index
      %c0_13 = arith.constant 0 : index
      %16 = vector.load %arg3[%c0_12, %c0_13] : memref<2x32xf32, #tpu.memory_space<vmem>>, vector<2x32xf32>
      %cst_14 = arith.constant dense<0.000000e+00> : vector<2x1xf32>
      %17 = tpu.matmul %16, %15, %cst_14 {dimension_numbers = #tpu.dot_dimension_numbers<[1], [0], [0], [1], [0, 0, 1, 1], [], []>} : vector<2x32xf32>, vector<32x1xf32>, vector<2x1xf32> -> vector<2x1xf32>
      %c0_15 = arith.constant 0 : index
      %c0_16 = arith.constant 0 : index
      %18 = vector.load %arg4[%c0_15, %c0_16] : memref<2x1xf32, #tpu.memory_space<vmem>>, vector<2x1xf32>
      %19 = arith.addf %17, %18 : vector<2x1xf32>
      %c0_17 = arith.constant 0 : index
      %c0_18 = arith.constant 0 : index
      %20 = vector.load %arg5[%c0_17, %c0_18] : memref<32x2xf32, #tpu.memory_space<vmem>>, vector<32x2xf32>
      %cst_19 = arith.constant dense<0.000000e+00> : vector<32x1xf32>
      %21 = tpu.matmul %20, %19, %cst_19 {dimension_numbers = #tpu.dot_dimension_numbers<[1], [0], [0], [1], [0, 0, 1, 1], [], []>} : vector<32x2xf32>, vector<2x1xf32>, vector<32x1xf32> -> vector<32x1xf32>
      %c0_20 = arith.constant 0 : index
      %c0_21 = arith.constant 0 : index
      %22 = vector.load %arg6[%c0_20, %c0_21] : memref<32x1xf32, #tpu.memory_space<vmem>>, vector<32x1xf32>
      %23 = arith.addf %21, %22 : vector<32x1xf32>
      %24 = vector.shape_cast %23 : vector<32x1xf32> to vector<1x32x1xf32>
      %c0_22 = arith.constant 0 : index
      %c0_23 = arith.constant 0 : index
      %c0_24 = arith.constant 0 : index
      %25 = vector.load %arg7[%c0_22, %c0_23, %c0_24] : memref<1x32x1xf32, #tpu.memory_space<vmem>>, vector<1x32x1xf32>
      tpu.vector_store %arg7[%c0_22, %c0_23, %c0_24], %24 {strides = array<i32>} : memref<1x32x1xf32, #tpu.memory_space<vmem>>, vector<1x32x1xf32>,
    } else {
    }
    return
  }
  func.func @transform_0(%arg0: i32, %arg1: i32) -> (i32, i32, i32) {
    %c0_i32 = arith.constant 0 : i32
    %c0_i32_0 = arith.constant 0 : i32
    return %arg0, %c0_i32, %arg1 : i32, i32, i32
  }
  func.func @transform_1(%arg0: i32, %arg1: i32) -> (i32, i32) {
    %c0_i32 = arith.constant 0 : i32
    %c0_i32_0 = arith.constant 0 : i32
    %c0_i32_1 = arith.constant 0 : i32
    return %c0_i32, %c0_i32_0 : i32, i32
  }
  func.func @transform_2(%arg0: i32, %arg1: i32) -> (i32, i32) {
    %c0_i32 = arith.constant 0 : i32
    %c0_i32_0 = arith.constant 0 : i32
    %c0_i32_1 = arith.constant 0 : i32
    return %c0_i32, %c0_i32_0 : i32, i32
  }
  func.func @transform_3(%arg0: i32, %arg1: i32) -> (i32, i32) {
    %c0_i32 = arith.constant 0 : i32
    %c0_i32_0 = arith.constant 0 : i32
    %c0_i32_1 = arith.constant 0 : i32
    return %c0_i32, %c0_i32_0 : i32, i32
  }
  func.func @transform_4(%arg0: i32, %arg1: i32) -> (i32, i32) {
    %c0_i32 = arith.constant 0 : i32
    %c0_i32_0 = arith.constant 0 : i32
    %c0_i32_1 = arith.constant 0 : i32
    return %c0_i32, %c0_i32_0 : i32, i32
  }
  func.func @transform_5(%arg0: i32, %arg1: i32) -> (i32, i32, i32) {
    %c0_i32 = arith.constant 0 : i32
    %c0_i32_0 = arith.constant 0 : i32
    %c0_i32_1 = arith.constant 0 : i32
    return %arg0, %c0_i32, %c0_i32_0 : i32, i32, i32
  }
}

</mosaic_0001>

<bundles_post_ra>
// kernel: tpu_custom_call.1
= control target key start
LH: loop header
LB: loop body
LE: loop exit
PB: predicated region body
PF: predicated region fallthrough
CT: control target
= control target key end

     0   :  { %10 = vsyncpa [#allocation4], 0  ;;  %s945_s0 = inlined_call_operand.hbm [shape: f32[2,32,256], index: 0, kind: input, shape index: {}]   ;;  %s946_s1 = inlined_call_operand.vmem [shape: f32[2,32], index: 1, kind: input, shape index: {}]   ;;  %s947_s2 = inlined_call_operand.vmem [shape: f32[2,1], index: 2, kind: input, shape index: {}]   ;;  %s948_s3 = inlined_call_operand.vmem [shape: f32[32,2], index: 3, kind: input, shape index: {}]   ;;  %s949_s4 = inlined_call_operand.vmem [shape: f32[32,1], index: 4, kind: input, shape index: {}]   ;;  %s950_s5 = inlined_call_operand.vmem [shape: f32[2,32,1], index: 5, kind: output, shape index: {}]  }
   0x1   :  { %12 = vsyncpa [#allocation4 + $0x1], 0  ;;  %s807_s18 = smov 0   ;;  %s809_s19 = smov 0  }
   0x2   :  { %s811_s20 = smov 0   ;;  %s813_s21 = smov 0  }
   0x3   :  { %s815_s22 = smov 0   ;;  %s817_s23 = smov 0  }
   0x4 LB: > { %s583_s24 = sadd.s32 4294967295, %s770_s23   ;;  %s30_s25 = sadd.s32 1, %s766_s22  ;;  %s770_s23 = sphi %s817_s23, %s18_s23   ;;  %s766_s22 = sphi %s815_s22, %s958_s22   ;;  %s762_s21 = sphi %s813_s21, %s957_s21   ;;  %s758_s20 = sphi %s811_s20, %s956_s20   ;;  %s754_s19 = sphi %s809_s19, %s955_s19   ;;  %s750_s18 = sphi %s807_s18, %s954_s18  }
   0x5   : > { %p32_p0 = scmp.ge.s32.totalorder %s30_s25, 2  ;;  %s39_s26 = sadd.s32 1, %s758_s20 }
   0x6   : > { %p46_p1 = scmp.ne.s32.totalorder %s758_s20, %s754_s19  ;;  %p47_p2 = scmp.eq.s32.totalorder %s770_s23, 0 }
   0x7   : > { %s960_s25 = smov (%p32_p0, %s30_s25), 0  ;;  %p52_p4 = scmp.ne.s32.totalorder %s754_s19, %s750_s18 }
   0x8   : > { %p843_p3 = por %p47_p2, %p46_p1  ;;  %s34_s28 = ssub.s32 %s766_s22, %s960_s25 }
   0x9   : > { %p53_p5 = scmp.eq.s32.totalorder %s583_s24, 0  ;;  %p37_p6 = scmp.eq.s32.totalorder %s34_s28, 0 }
   0xa   : > { %p639_p8 = scmp.lt.s32.totalorder %s770_s23, 2  ;;  %s198_s6 = sand.u32 1, %s758_s20  }
   0xb   : > { %p850_p7 = por %p53_p5, %p52_p4  ;;  %s602_s7 = sshll.u32 %s766_s22, 10 }
   0xc   : > { %s856_s30 = scalar_select %p37_p6, %s758_s20, %s39_s26  }
   0xd   : > { %s587_s8 = sshll.u32 %s198_s6, 6  ;;  %s210_s11 = scalar_lea.hbm %s945_s0, %s602_s7 }
   0xe   : > { %s202_s12 = scalar_lea.vmem [#allocation3], %s587_s8  ;;  %p865_p9 = pnand %p639_p8, %p843_p3 }
   0xf   : > { %s211_s13 = sshll.u32 %s202_s12, 4  ;;  %s199_s15 = scalar_lea.sflag [#allocation4], %s198_s6  ;;  %s212_s13 = int_to_ptr.vmem [resolvable:$true] %s211_s13 }
  0x10   : > { %p694_p10 = pneg %p865_p9  ;;  %s705_s16 = scalar_lea.vmem %s212_s13, 1024 }
  0x11   : > { %p706_p11 = scmp.ne.s32.totalorder %s212_s13, %s705_s16  ;;  %s772_s17 = smov [#allocation3]  }
  0x12   : > { %s710_s18 = sshll.u32 %s772_s17, 4  ;;  %s711_s18 = int_to_ptr.vmem [resolvable:$false] %s710_s18 }
  0x13   : > { %p708_p12 = pnand %p706_p11, %p694_p10  ;;  %s712_s24 = scalar_lea.vmem %s711_s18, 2048 }
  0x14   : > { %p713_p0 = scmp.lt.s32.totalorder %s212_s13, %s711_s18  ;;  %p714_p1 = scmp.lt.s32.totalorder %s712_s24, %s705_s16 }
  0x15   : > { %p709_p13 = pneg %p708_p12 }
  0x16   : > { %p715_p2 = por %p714_p1, %p713_p0 }
  0x18   : > { %p716_p3 = pnand %p715_p2, %p709_p13 }
  0x1a   : > { %719 = shalt.err (!%p716_p3)
}
  0x1b   : > { %s773_s26 = smov 256   ;;  %s774_s27 = smov 16  }
  0x1c   : > { %638 = dma.hbm_to_vmem [thread:$0]  (!%p865_p9), %s210_s11, 1024, %s212_s13, %s199_s15, %s773_s26, %s773_s26, %s774_s27  }
  0x1d   : > { %p590_p4 = scmp.ge.s32.totalorder %s770_s23, 1  ;;  %p219_p5 = scmp.lt.s32.totalorder %s770_s23, 3 }
  0x1f   : > { %p220_p6 = pnand %p590_p4, %p219_p5 }
  0x20   : > { %s225_s28 = sand.u32 (!%p220_p6), 1, %s754_s19  }
  0x21   : > { %223 = sbr.rel (%p220_p6) target bundleno = 600 (0x258), region = 40  ;;  %s591_s6 = sshll.u32 (!%p220_p6), %s225_s28, 6 }
  0x22   : > { %s226_s7 = scalar_lea.sflag (!%p220_p6), [#allocation4], %s225_s28  ;;  %s229_s8 = scalar_lea.vmem (!%p220_p6), [#allocation3], %s591_s6 }
  0x26   : > { %745 = dma.done.wait (%p850_p7), %s226_s7, 1024  }
  0x27   : > { %747 = vsyncadd (%p850_p7), %s226_s7, 4294966272  ;;  %vm266_vm0 = vcmask 7168   ;;  %v775_v0 = vmov 0.0   ;;  %v277_v1 = vld [vmem:[%s229_s8 + $0x30] sm:$0xff]  ;;  %v278_v2 = vld [vmem:[%s229_s8 + $0x38] sm:$0xff]  ;;  %vm776_vm1 = vmmov 0  }
  0x28   : > { %270 = vst.msk [vmem:[#allocation2 + $0x18] sm:$0xff] %vm266_vm0, %v775_v0  ;;  %267 = vst.msk [vmem:[#allocation2] sm:$0xff] %vm266_vm0, %v775_v0  ;;  %614 = vmatprep.subr.mxu0 %v775_v0  ;;  %v275_v3 = vld [vmem:[%s229_s8 + $0x20] sm:$0xff]  ;;  %v292_v4 = vadd.f32 %v278_v2, %v277_v1  ;;  %v276_v5 = vld [vmem:[%s229_s8 + $0x28] sm:$0xff]  ;;  %622 = vmatprep.mubr.msk.f32.mxu0 %vm776_vm1, %v775_v0  ;;  %vm317_vm2 = vcmask 261120   ;;  %vm399_vm3 = vcmask 15360  }
  0x29   : > { %268 = vst.msk [vmem:[#allocation2 + $0x8] sm:$0xff] %vm266_vm0, %v775_v0  ;;  %269 = vst.msk [vmem:[#allocation2 + $0x10] sm:$0xff] %vm266_vm0, %v775_v0  ;;  %v273_v6 = vld [vmem:[%s229_s8 + $0x10] sm:$0xff]  ;;  %v274_v7 = vld [vmem:[%s229_s8 + $0x18] sm:$0xff]  ;;  %v289_v11 = vadd.f32 %v276_v5, %v275_v3  ;;  %vm412_vm4 = vcmask 1041408   ;;  %p257_p7 = scmp.lt.s32.totalorder %s762_s21, 1 }
  0x2a   : > { %v286_v8 = vadd.f32 %v274_v7, %v273_v6  ;;  %v271_v9 = vld [vmem:[%s229_s8] sm:$0xff]  ;;  %v272_v10 = vld [vmem:[%s229_s8 + $0x8] sm:$0xff]  ;;  %293 = vadd.xlane.f32.xlu0 %v292_v4  ;;  %v393_v40 = vld [vmem:[%s948_s3 + $0x10] sm:$0xff] }
  0x2b   : > { %v283_v12 = vadd.f32 %v272_v10, %v271_v9  ;;  %v315_v33 = vld [vmem:[%s946_s1] sm:$0x3]  ;;  %v392_v39 = vld [vmem:[%s948_s3 + $0x8] sm:$0xff]  ;;  %v394_v41 = vld [vmem:[%s948_s3 + $0x18] sm:$0xff]  ;;  %s962_s21 = smov (!%p257_p7, %s762_s21), 1 }
  0x2c   : > { %287 = vadd.xlane.f32.xlu1 %v286_v8  ;;  %v391_v34 = vld [vmem:[%s948_s3] sm:$0xff]  ;;  %s603_s26 = sshll.u32 %s962_s21, 5  ;;  %v396_v42 = vld [vmem:[%s949_s4 + $0x8] sm:$0xff]  ;;  %v398_v47 = vld [vmem:[%s949_s4 + $0x18] sm:$0xff] }
  0x2d   : > { %627 = vmatprep.mubr.msk.f32.mxu1 %vm399_vm3, %v391_v34  ;;  %v316_v35 = vld [vmem:[%s947_s2] sm:$0x3]  ;;  %s261_s8 = scalar_lea.vmem %s950_s5, %s603_s26  ;;  %v397_v50 = vld [vmem:[%s949_s4 + $0x10] sm:$0xff] }
  0x2e   : > { %290 = vadd.xlane.f32.xlu0 %v289_v11  ;;  %v395_v44 = vld [vmem:[%s949_s4] sm:$0xff] }
  0x2f   : > { %v282_v13 = vld [vmem:[#allocation2 + $0x18] sm:$0xff]  ;;  %v279_v20 = vld [vmem:[#allocation2] sm:$0xff] }
  0x30   : > { %284 = vadd.xlane.f32.xlu1 %v283_v12  ;;  %v280_v14 = vld [vmem:[#allocation2 + $0x8] sm:$0xff]  ;;  %v281_v18 = vld [vmem:[#allocation2 + $0x10] sm:$0xff] }
  0xb3   : > { %v294_v15 = vpop.xlane.xlu0 %293 }
  0xb4   : > { %v298_v16 = vadd.f32 %v294_v15, %v282_v13 }
  0xb5   : > { %v288_v17 = vpop.xlane.xlu1 %287 }
  0xb6   : > { %v296_v19 = vadd.f32 %v288_v17, %v280_v14  ;;  %303 = vst.msk [vmem:[#allocation2 + $0x18] sm:$0xff] %vm266_vm0, %v298_v16 }
  0xb7   : > { %v291_v21 = vpop.xlane.xlu0 %290 }
  0xb8   : > { %301 = vst.msk [vmem:[#allocation2 + $0x8] sm:$0xff] %vm266_vm0, %v296_v19  ;;  %v297_v22 = vadd.f32 %v291_v21, %v281_v18 }
  0xb9   : > { %v285_v23 = vpop.xlane.xlu1 %284 }
  0xba   : > { %v295_v24 = vadd.f32 %v285_v23, %v279_v20  ;;  %302 = vst.msk [vmem:[#allocation2 + $0x10] sm:$0xff] %vm266_vm0, %v297_v22 }
  0xbc   : > { %300 = vst.msk [vmem:[#allocation2] sm:$0xff] %vm266_vm0, %v295_v24 }
  0xbd   : > { %v310_v25 = vld [vmem:[#allocation2 + $0x18] sm:$0xff] }
  0xbe   : > { %v314_v26 = vmul.f32 0.00390625, %v310_v25 }
  0xbf   : > { %v308_v28 = vld [vmem:[#allocation2 + $0x8] sm:$0xff] }
  0xc0   : > { %615 = vmatpush3.msra.mxu0 %v314_v26  ;;  %v312_v31 = vmul.f32 0.00390625, %v308_v28 }
  0xc1   : > { %616 = vmatprep.subr.mxu0 %v775_v0  ;;  %v309_v27 = vld [vmem:[#allocation2 + $0x10] sm:$0xff] }
  0xc2   : > { %v313_v29 = vmul.f32 0.00390625, %v309_v27 }
  0xc3   : > { %v307_v30 = vld [vmem:[#allocation2] sm:$0xff] }
  0xc4   : > { %617 = vmatpush3.msra.mxu0 %v313_v29  ;;  %v311_v32 = vmul.f32 0.00390625, %v307_v30 }
  0xc5   : > { %618 = vmatprep.subr.mxu0 %v775_v0 }
  0xc6   : > { %619 = vmatpush3.msra.mxu0 %v312_v31 }
  0xc7   : > { %620 = vmatprep.subr.mxu0 %v775_v0 }
  0xc8   : > { %621 = vmatpush3.msra.mxu0 %v311_v32 }
  0xc9   : > { %623 = vmatmul.mubr.msk.f32.vlgmr.msra.gmra.mxu0 %vm317_vm2, %v315_v33 }
 0x189   : > { %v387_v36 = vpop.f32.mrf.mxu0 }
 0x18a   : > { %v388_v37 = vadd.f32 %v387_v36, %v316_v35 }
 0x18b   : > { %v624_v38 = vpop.f32.mrf.mxu0 }
 0x18c   : > { %625 = vmatprep.subr.msk.mxu1 %vm412_vm4, %v388_v37 }
 0x18d   : > { %626 = vmatpush3.msk.msra.mxu1 %vm412_vm4, %v388_v37 }
 0x18e   : > { %628 = vmatmul.mubr.msk.f32.vlgmr.msra.gmra.mxu1 %vm399_vm3, %v392_v39 }
 0x18f   : > { %630 = vmatprep.mubr.msk.f32.mxu1 %vm399_vm3, %v393_v40 }
 0x192   : > { %631 = vmatmul.mubr.msk.f32.gmra.mxu1 %vm399_vm3, %v394_v41 }
 0x24e   : > { %v629_v43 = vpop.f32.mrf.mxu1 }
 0x24f   : > { %v488_v45 = vadd.f32 %v629_v43, %v396_v42 }
 0x250   : > { %v482_v46 = vpop.f32.mrf.mxu1 }
 0x251   : > { %502 = vst.msk [vmem:[%s261_s8 + $0x8] sm:$0xff] %vm266_vm0, %v488_v45  ;;  %v483_v48 = vadd.f32 %v482_v46, %v395_v44 }
 0x252   : > { %v632_v49 = vpop.f32.mrf.mxu1 }
 0x253   : > { %501 = vst.msk [vmem:[%s261_s8] sm:$0xff] %vm266_vm0, %v483_v48  ;;  %v498_v51 = vadd.f32 %v632_v49, %v398_v47 }
 0x254   : > { %v492_v52 = vpop.f32.mrf.mxu1 }
 0x255   : > { %504 = vst.msk [vmem:[%s261_s8 + $0x18] sm:$0xff] %vm266_vm0, %v498_v51  ;;  %v493_v53 = vadd.f32 %v492_v52, %v397_v50 }
 0x257   : > { %503 = vst.msk [vmem:[%s261_s8 + $0x10] sm:$0xff] %vm266_vm0, %v493_v53 }
 0x258 PF: > { %s18_s23 = sadd.s32 1, %s770_s23   ;;  %s954_s18 = smov %s754_s19 }
 0x259   : > { %p15_p8 = scmp.ge.s32.totalorder %s18_s23, 4   ;;  %s955_s19 = smov %s758_s20 }
 0x25a   : > { %s956_s20 = smov %s856_s30  ;;  %s957_s21 = smov %s766_s22 }
 0x25b   : > { %s958_s22 = smov %s960_s25  ;;  %17 = sbr.rel (!%p15_p8) target bundleno = 4 (0x4), region = 88 }
 0x260   :  { %526 = vsyncpa [#allocation4], 1 }
 0x261   :  { %528 = vsyncpa [#allocation4 + $0x1], 1 }

</bundles_post_ra>
